<compile_context>
chip_gen: v7x
topology: tpu7x:2x2x1
jax: 0.10.0
libtpu: 0.0.40
codegen_flags: <defaults>
</compile_context>

<pallas_src>
import functools

import jax
import jax.numpy as jnp
from jax.experimental import pallas as pl
from jax.experimental.pallas import tpu as pltpu

SELU_ALPHA = 1.6732632423543772
SELU_SCALE = 1.0507009873554805


def _round_up(x, m):
    return ((x + m - 1) // m) * m


def _cdiv(a, b):
    return (a + b - 1) // b


def _sublane_multiple(dtype):
    # dtype-dependent second-minor tiling: 8 (f32) / 16 (bf16) / 32 (int8/fp8).
    return max(8, 32 // max(jnp.dtype(dtype).itemsize, 1))


def _pack_factor(d):
    # Lane-packing factor: pack p logical rows into one 128-lane row when the
    # feature dim divides 128.  NOTE: D < 128 with 128 % D != 0 falls back to
    # p=1 and pays masked (low lane-utilization) stores; pad D up to 128 with
    # zero feature columns upstream if that case matters.
    return 128 // d if (d < 128 and 128 % d == 0) else 1


def _tensorcores_per_chip():
    # Gate the megacore grid split on chips that actually have 2 TensorCores
    # (v7x).  Single-TC chips (v5e / v6e) keep one big tile per grid step.
    try:
        dev = jax.devices()[0]
        cores = getattr(dev, "num_cores", None)
        if isinstance(cores, int) and cores > 0:
            return cores
        if "v7" in str(getattr(dev, "device_kind", "")).lower():
            return 2
    except Exception:
        pass
    return 1


_NUM_TC = _tensorcores_per_chip()


def ffn_kernel(wf_ref, x_ref, w1_ref, b1_ref, w2_ref, b2_ref, o_ref):
    # x_ref: (tm, Dp) features; w1_ref: (Dp, Hp) bf16; b1_ref: (1, Hp) f32;
    # w2_ref: (Hp, Dp) bf16 (SELU_SCALE pre-folded); b2_ref: (1, Dp) f32;
    # wf_ref: (1, 1) SMEM scalar; o_ref: (tm, Dp).
    x = x_ref[...]
    h = jnp.dot(x.astype(w1_ref.dtype), w1_ref[...],
                preferred_element_type=jnp.float32) + b1_ref[...]
    # SELU with its output scale folded into W2: only the where/exp part here.
    h = jnp.where(h > 0, h, SELU_ALPHA * (jnp.exp(h) - 1.0))
    y = jnp.dot(h.astype(w2_ref.dtype), w2_ref[...],
                preferred_element_type=jnp.float32) + b2_ref[...]
    o_ref[...] = (wf_ref[0, 0] * y + x.astype(jnp.float32)).astype(o_ref.dtype)


def prepare_ffn_params(w1, b1, w2, b2):
    """One-time parameter packing, hoisted out of the per-call jitted path.

    w1: (H, D) = scale_linear.weight, b1: (H,),
    w2: (D, H) = scale_out_linear.weight, b2: (D,).
    Returns lane-packed, SELU_SCALE-folded, bf16 matmul operands.
    """
    H, D = w1.shape
    p = _pack_factor(D)
    w1_t = jnp.asarray(w1, jnp.float32).T                    # (D, H)
    w2_t = jnp.asarray(w2, jnp.float32).T * SELU_SCALE       # (H, D), scale folded
    b1_r = jnp.asarray(b1, jnp.float32).reshape(1, H)
    b2_r = jnp.asarray(b2, jnp.float32).reshape(1, D)
    if p > 1:
        eye = jnp.eye(p, dtype=jnp.float32)
        w1_p = jnp.kron(eye, w1_t)                           # (p*D, p*H) block-diag
        w2_p = jnp.kron(eye, w2_t)                           # (p*H, p*D) block-diag
        b1_p = jnp.tile(b1_r, (1, p))                        # (1, p*H)
        b2_p = jnp.tile(b2_r, (1, p))                        # (1, p*D)
    else:
        w1_p, w2_p, b1_p, b2_p = w1_t, w2_t, b1_r, b2_r
    # bf16 matmul operands: numerically what the MXU does anyway at DEFAULT
    # precision, but halves resident-weight VMEM / HBM bytes.
    return (w1_p.astype(jnp.bfloat16), b1_p,
            w2_p.astype(jnp.bfloat16), b2_p)


@functools.partial(jax.jit, static_argnames=("tm",))
def ffn_pallas(features, w1_p, b1_p, w2_p, b2_p, weights_factor, *, tm=1024):
    orig_shape = features.shape
    D = orig_shape[-1]
    p = _pack_factor(D)
    Dp = p * D
    Hp = w1_p.shape[1]
    assert w1_p.shape == (Dp, Hp) and w2_p.shape == (Hp, Dp), "params/features mismatch"

    x2d = features.reshape(-1, D)
    M = x2d.shape[0]

    # Pad only to the lane-packing multiple p (at most p-1 rows, often none);
    # the ragged last row-tile is handled by Pallas' partial-block masking, so
    # there is no pad-to-tile / slice-back round trip through HBM.
    m_pad = _round_up(M, p)
    if m_pad != M:
        x2d = jnp.pad(x2d, ((0, m_pad - M), (0, 0)))
    mp = m_pad // p
    x_p = x2d.reshape(mp, Dp)          # lane-dense packed input (contiguous reshape)

    sub = _sublane_multiple(features.dtype)
    tm_rounded = _round_up(max(int(tm), sub), sub)
    # Single full-extent block when the whole packed input fits in one tile
    # (block dim == full array dim is always legal); otherwise a sublane-
    # aligned tile with a ragged (masked) last block.
    tm_eff = mp if mp <= tm_rounded else tm_rounded
    steps = _cdiv(mp, tm_eff)
    # v7x megacore: target an even number of balanced grid steps so both
    # TensorCores get equal work; no-op on single-TC v5e/v6e.
    if _NUM_TC >= 2 and steps % 2 != 0 and mp > sub:
        tm_eff = max(sub, _round_up(_cdiv(mp, steps + 1), sub))
        steps = _cdiv(mp, tm_eff)

    wf = jnp.asarray(weights_factor, jnp.float32).reshape(1, 1)

    out = pl.pallas_call(
        ffn_kernel,
        out_shape=jax.ShapeDtypeStruct((mp, Dp), features.dtype),
        grid_spec=pltpu.PrefetchScalarGridSpec(
            num_scalar_prefetch=0,
            grid=(steps,),
            in_specs=[
                pl.BlockSpec(memory_space=pltpu.SMEM),         # weights_factor
                pl.BlockSpec((tm_eff, Dp), lambda i: (i, 0)),  # packed x tile
                # Constant index_maps => weights/biases stay VMEM-resident for
                # the whole grid.  (pipeline_mode=pl.Buffered(1) would drop the
                # redundant second buffer; omitted -- negligible at these
                # sizes and keeps lowering maximally portable.)
                pl.BlockSpec((Dp, Hp), lambda i: (0, 0)),      # W1 (bf16)
                pl.BlockSpec((1, Hp), lambda i: (0, 0)),       # b1
                pl.BlockSpec((Hp, Dp), lambda i: (0, 0)),      # W2 (bf16, scale folded)
                pl.BlockSpec((1, Dp), lambda i: (0, 0)),       # b2
            ],
            out_specs=pl.BlockSpec((tm_eff, Dp), lambda i: (i, 0)),
        ),
        compiler_params=pltpu.CompilerParams(
            dimension_semantics=("parallel",),
        ),
    )(wf, x_p, w1_p, b1_p, w2_p, b2_p)

    out = out.reshape(m_pad, D)
    if m_pad != M:
        out = out[:M]
    return out.reshape(orig_shape)


# ----------------------------- reference / test ------------------------------

def _selu(x):
    # torch.selu semantics: scale * (max(0,x) + min(0, alpha*(exp(x)-1)))
    return SELU_SCALE * jnp.where(x > 0, x, SELU_ALPHA * (jnp.exp(x) - 1.0))


def reference_ffn(features, w1, b1, w2, b2, weights_factor=1.0):
    # Plain-JAX reference mirroring the PyTorch forward (w1: (H,D), w2: (D,H)).
    x = features @ w1.T + b1
    x = _selu(x)
    x = x @ w2.T + b2
    return weights_factor * x + features


def xavier_normal(key, shape):
    # torch.nn.init.xavier_normal_ on a (fan_out, fan_in) Linear weight.
    fan_out, fan_in = shape
    std = (2.0 / (fan_in + fan_out)) ** 0.5
    return std * jax.random.normal(key, shape, dtype=jnp.float32)


if __name__ == "__main__":
    # Small shapes consistent with the module: in_size=32, excitation_factor=4.
    in_size, exc = 32, 4
    hidden = in_size * exc  # 128

    key = jax.random.PRNGKey(0)
    k_x1, k_x2, k_w1, k_w2 = jax.random.split(key, 4)

    # Parameters (PyTorch Linear shapes: scale_linear (H, D), scale_out (D, H)).
    w1 = xavier_normal(k_w1, (hidden, in_size))
    b1 = jnp.zeros((hidden,), jnp.float32)
    w2 = xavier_normal(k_w2, (in_size, hidden))
    b2 = jnp.zeros((in_size,), jnp.float32)

    # One-time packing (kron / tile / SELU_SCALE fold / bf16 cast) outside jit.
    params = prepare_ffn_params(w1, b1, w2, b2)

    # bf16-class matmul accuracy (same as the MXU's DEFAULT single bf16 pass),
    # hence the 3e-2 tolerance against the plain-JAX f32-weight reference.
    tol = dict(atol=3e-2, rtol=3e-2)

    # Case 1: batch=2, seq=8 (rows divisible by the packing factor).
    feats1 = jax.random.normal(k_x1, (2, 8, in_size), dtype=jnp.float32)
    out1 = jax.block_until_ready(ffn_pallas(feats1, *params, 1.0))
    ref1 = reference_ffn(feats1, w1, b1, w2, b2, 1.0)
    assert out1.shape == feats1.shape
    assert jnp.allclose(out1, ref1, **tol), "case1 mismatch"

    # Case 2: ragged row count (3*5=15 rows) + non-unit weights_factor,
    # exercises the small p-alignment pad + ragged-tile path.
    feats2 = jax.random.normal(k_x2, (3, 5, in_size), dtype=jnp.float32)
    out2 = jax.block_until_ready(ffn_pallas(feats2, *params, 0.5))
    ref2 = reference_ffn(feats2, w1, b1, w2, b2, 0.5)
    assert out2.shape == feats2.shape
    assert jnp.allclose(out2, ref2, **tol), "case2 mismatch"

    print("KERNEL_OK")
</pallas_src>

<mosaic_0001>
module attributes {stable_mosaic.version = 11 : i64} {
  func.func @ffn_kernel(%arg0: i32, %arg1: memref<1x1xf32, #tpu.memory_space<smem>>, %arg2: memref<4x128xf32, #tpu.memory_space<vmem>>, %arg3: memref<128x512xbf16, #tpu.memory_space<vmem>>, %arg4: memref<1x512xf32, #tpu.memory_space<vmem>>, %arg5: memref<512x128xbf16, #tpu.memory_space<vmem>>, %arg6: memref<1x128xf32, #tpu.memory_space<vmem>>, %arg7: memref<4x128xf32, #tpu.memory_space<vmem>>) attributes {dimension_semantics = [#tpu.dimension_semantics<parallel>], iteration_bounds = array<i64: 1>, scalar_prefetch = 0 : i64, scratch_operands = 0 : i64, tpu.core_type = #tpu.core_type<tc>, window_params = [{transform_indices = @transform_0, window_bounds = array<i64: 1, 1>}, {transform_indices = @transform_1, window_bounds = array<i64: 4, 128>}, {pipeline_mode = #tpu.pipeline_mode<synchronous>, transform_indices = @transform_2, window_bounds = array<i64: 128, 512>}, {pipeline_mode = #tpu.pipeline_mode<synchronous>, transform_indices = @transform_3, window_bounds = array<i64: 1, 512>}, {pipeline_mode = #tpu.pipeline_mode<synchronous>, transform_indices = @transform_4, window_bounds = array<i64: 512, 128>}, {pipeline_mode = #tpu.pipeline_mode<synchronous>, transform_indices = @transform_5, window_bounds = array<i64: 1, 128>}, {transform_indices = @transform_6, window_bounds = array<i64: 4, 128>}]} {
    %c0 = arith.constant 0 : index
    %c0_0 = arith.constant 0 : index
    %0 = vector.load %arg2[%c0, %c0_0] : memref<4x128xf32, #tpu.memory_space<vmem>>, vector<4x128xf32>
    %1 = arith.truncf %0 : vector<4x128xf32> to vector<4x128xbf16>
    %c0_1 = arith.constant 0 : index
    %c0_2 = arith.constant 0 : index
    %2 = vector.load %arg3[%c0_1, %c0_2] : memref<128x512xbf16, #tpu.memory_space<vmem>>, vector<128x512xbf16>
    %cst = arith.constant dense<0.000000e+00> : vector<4x512xf32>
    %3 = tpu.matmul %1, %2, %cst {dimension_numbers = #tpu.dot_dimension_numbers<[1], [0], [0], [1], [0, 0, 1, 1], [], []>} : vector<4x128xbf16>, vector<128x512xbf16>, vector<4x512xf32> -> vector<4x512xf32>
    %c0_3 = arith.constant 0 : index
    %c0_4 = arith.constant 0 : index
    %4 = vector.load %arg4[%c0_3, %c0_4] : memref<1x512xf32, #tpu.memory_space<vmem>>, vector<1x512xf32>
    %5 = vector.broadcast %4 : vector<1x512xf32> to vector<4x512xf32>
    %6 = arith.addf %3, %5 : vector<4x512xf32>
    %cst_5 = arith.constant 0.000000e+00 : f32
    %7 = vector.broadcast %cst_5 : f32 to vector<4x512xf32>
    %8 = arith.cmpf ogt, %6, %7 : vector<4x512xf32>
    %9 = math.exp %6 : vector<4x512xf32>
    %cst_6 = arith.constant 1.000000e+00 : f32
    %10 = vector.broadcast %cst_6 : f32 to vector<4x512xf32>
    %11 = arith.subf %9, %10 : vector<4x512xf32>
    %cst_7 = arith.constant 1.67326319 : f32
    %12 = vector.broadcast %cst_7 : f32 to vector<4x512xf32>
    %13 = arith.mulf %12, %11 : vector<4x512xf32>
    %14 = arith.select %8, %6, %13 : vector<4x512xi1>, vector<4x512xf32>
    %15 = arith.truncf %14 : vector<4x512xf32> to vector<4x512xbf16>
    %c0_8 = arith.constant 0 : index
    %c0_9 = arith.constant 0 : index
    %16 = vector.load %arg5[%c0_8, %c0_9] : memref<512x128xbf16, #tpu.memory_space<vmem>>, vector<512x128xbf16>
    %cst_10 = arith.constant dense<0.000000e+00> : vector<4x128xf32>
    %17 = tpu.matmul %15, %16, %cst_10 {dimension_numbers = #tpu.dot_dimension_numbers<[1], [0], [0], [1], [0, 0, 1, 1], [], []>} : vector<4x512xbf16>, vector<512x128xbf16>, vector<4x128xf32> -> vector<4x128xf32>
    %c0_11 = arith.constant 0 : index
    %c0_12 = arith.constant 0 : index
    %18 = vector.load %arg6[%c0_11, %c0_12] : memref<1x128xf32, #tpu.memory_space<vmem>>, vector<1x128xf32>
    %19 = vector.broadcast %18 : vector<1x128xf32> to vector<4x128xf32>
    %20 = arith.addf %17, %19 : vector<4x128xf32>
    %c0_13 = arith.constant 0 : index
    %c0_14 = arith.constant 0 : index
    %21 = memref.load %arg1[%c0_13, %c0_14] : memref<1x1xf32, #tpu.memory_space<smem>>
    %22 = vector.broadcast %21 : f32 to vector<4x128xf32>
    %23 = arith.mulf %22, %20 : vector<4x128xf32>
    %24 = arith.addf %23, %0 : vector<4x128xf32>
    %c0_15 = arith.constant 0 : index
    %c0_16 = arith.constant 0 : index
    %25 = vector.load %arg7[%c0_15, %c0_16] : memref<4x128xf32, #tpu.memory_space<vmem>>, vector<4x128xf32>
    tpu.vector_store %arg7[%c0_15, %c0_16], %24 {strides = array<i32>} : memref<4x128xf32, #tpu.memory_space<vmem>>, vector<4x128xf32>,
    return
  }
  func.func @transform_0(%arg0: i32) -> (i32, i32) {
    %c0_i32 = arith.constant 0 : i32
    %c0_i32_0 = arith.constant 0 : i32
    %c0_i32_1 = arith.constant 0 : i32
    return %c0_i32, %c0_i32_0 : i32, i32
  }
  func.func @transform_1(%arg0: i32) -> (i32, i32) {
    %c0_i32 = arith.constant 0 : i32
    %c0_i32_0 = arith.constant 0 : i32
    return %arg0, %c0_i32 : i32, i32
  }
  func.func @transform_2(%arg0: i32) -> (i32, i32) {
    %c0_i32 = arith.constant 0 : i32
    %c0_i32_0 = arith.constant 0 : i32
    %c0_i32_1 = arith.constant 0 : i32
    return %c0_i32, %c0_i32_0 : i32, i32
  }
  func.func @transform_3(%arg0: i32) -> (i32, i32) {
    %c0_i32 = arith.constant 0 : i32
    %c0_i32_0 = arith.constant 0 : i32
    %c0_i32_1 = arith.constant 0 : i32
    return %c0_i32, %c0_i32_0 : i32, i32
  }
  func.func @transform_4(%arg0: i32) -> (i32, i32) {
    %c0_i32 = arith.constant 0 : i32
    %c0_i32_0 = arith.constant 0 : i32
    %c0_i32_1 = arith.constant 0 : i32
    return %c0_i32, %c0_i32_0 : i32, i32
  }
  func.func @transform_5(%arg0: i32) -> (i32, i32) {
    %c0_i32 = arith.constant 0 : i32
    %c0_i32_0 = arith.constant 0 : i32
    %c0_i32_1 = arith.constant 0 : i32
    return %c0_i32, %c0_i32_0 : i32, i32
  }
  func.func @transform_6(%arg0: i32) -> (i32, i32) {
    %c0_i32 = arith.constant 0 : i32
    %c0_i32_0 = arith.constant 0 : i32
    return %arg0, %c0_i32 : i32, i32
  }
}

</mosaic_0001>

<bundles_post_ra>
// kernel: ffn_pallas.1
= control target key start
LH: loop header
LB: loop body
LE: loop exit
PB: predicated region body
PF: predicated region fallthrough
CT: control target
= control target key end

     0   :  { %12 = vsyncpa [#allocation4], 0  ;;  %s1075_s0 = inlined_call_operand.<no memory space> [shape: f32[1,1], index: 0, kind: input, shape index: {}]   ;;  %s1076_s1 = inlined_call_operand.vmem [shape: f32[4,128], index: 1, kind: input, shape index: {}]   ;;  %s1077_s2 = inlined_call_operand.hbm [shape: bf16[128,512], index: 2, kind: input, shape index: {}]   ;;  %s1078_s3 = inlined_call_operand.vmem [shape: f32[1,512], index: 3, kind: input, shape index: {}]   ;;  %s1079_s4 = inlined_call_operand.hbm [shape: bf16[512,128], index: 4, kind: input, shape index: {}]   ;;  %s1080_s5 = inlined_call_operand.vmem [shape: f32[1,128], index: 5, kind: input, shape index: {}]   ;;  %s1081_s6 = inlined_call_operand.vmem [shape: f32[4,128], index: 6, kind: output, shape index: {}]  }
   0x1   :  { %13 = vsyncpa [#allocation6], 0  ;;  %s989_s21 = smov [#allocation3]   ;;  %s941_s25 = scalar_lea.hbm %s1077_s2, 4096 }
   0x2   :  { %s23_s22 = sshll.u32 %s989_s21, 4  ;;  %p942_p0 = scmp.ne.s32.totalorder %s1077_s2, %s941_s25  ;;  %s24_s22 = int_to_ptr.vmem [resolvable:$true] %s23_s22 }
   0x3   :  { %p945_p1 = scmp.lt.u32.totalorder %s941_s25, %s1077_s2 }
   0x5   :  { %p947_p2 = pnand %p945_p1, %p942_p0 }
   0x7   :  { %950 = shalt.err (!%p947_p2)
}
   0x8   :  { %s951_s30 = scalar_lea.vmem %s24_s22, 4096  ;;  %p956_p4 = scmp.lt.s32.totalorder %s24_s22, %s24_s22 }
   0x9   :  { %p952_p3 = scmp.ne.s32.totalorder %s24_s22, %s951_s30  ;;  %p957_p5 = scmp.lt.s32.totalorder %s951_s30, %s951_s30 }
   0xb   :  { %p958_p6 = por %p957_p5, %p956_p4 }
   0xd   :  { %p959_p7 = pnand %p958_p6, %p952_p3 }
   0xf   :  { %962 = shalt.err (!%p959_p7)
}
  0x10   :  { %s990_s7 = smov 256   ;;  %s991_s8 = smov 16  }
  0x11   :  { %29 = dma.hbm_to_vmem [thread:$0]  %s1077_s2, 4096, %s24_s22, [#allocation4], %s990_s7, %s990_s7, %s991_s8  }
  0x12   :  { %s992_s11 = smov [#allocation5]   ;;  %s963_s15 = scalar_lea.hbm %s1079_s4, 4096 }
  0x13   :  { %s37_s12 = sshll.u32 %s992_s11, 4  ;;  %p964_p8 = scmp.ne.s32.totalorder %s1079_s4, %s963_s15  ;;  %s38_s12 = int_to_ptr.vmem [resolvable:$true] %s37_s12 }
  0x14   :  { %p967_p9 = scmp.lt.u32.totalorder %s963_s15, %s1079_s4 }
  0x16   :  { %p969_p10 = pnand %p967_p9, %p964_p8 }
  0x18   :  { %972 = shalt.err (!%p969_p10)
}
  0x19   :  { %s973_s20 = scalar_lea.vmem %s38_s12, 4096  ;;  %p978_p12 = scmp.lt.s32.totalorder %s38_s12, %s38_s12 }
  0x1a   :  { %p974_p11 = scmp.ne.s32.totalorder %s38_s12, %s973_s20  ;;  %p979_p13 = scmp.lt.s32.totalorder %s973_s20, %s973_s20 }
  0x1c   :  { %p980_p0 = por %p979_p13, %p978_p12 }
  0x1e   :  { %p981_p1 = pnand %p980_p0, %p974_p11 }
  0x20   :  { %984 = shalt.err (!%p981_p1)
}
  0x21   :  { %s993_s2 = smov 64   ;;  %s994_s21 = smov 4  }
  0x22   :  { %43 = dma.hbm_to_vmem [thread:$0]  %s1079_s4, 4096, %s38_s12, [#allocation6], %s993_s2, %s993_s2, %s994_s21  }
  0x23   :  { %985 = dma.done.wait [#allocation4], 4096  }
  0x24   :  { %986 = vsyncadd [#allocation4], 4294963200 }
  0x25   :  { %987 = dma.done.wait [#allocation6], 4096  }
  0x26   :  { %988 = vsyncadd [#allocation6], 4294963200  ;;  %v995_v0 = vmov 0   ;;  %v853_v1 = vld [vmem:[#allocation3 + $0x4] ss:$16 sps:$4 sm:$0xff]   ;;  %v905_v39 = vld [vmem:[#allocation5 + $0x48] sm:$0xff]  }
  0x27   :  { %301 = vmatprep.mubr.bf16.mxu0 %v995_v0  ;;  %342 = vmatprep.mubr.bf16.mxu1 %v995_v0  ;;  %v855_v2 = vld [vmem:[#allocation3 + $0xc] ss:$16 sps:$4 sm:$0xff]   ;;  %v857_v3 = vld [vmem:[#allocation3] ss:$16 sps:$4 sm:$0xff]   ;;  %v858_v4 = vld [vmem:[#allocation3 + $0x8] ss:$16 sps:$4 sm:$0xff]  }
  0x28   :  { %269 = vmatprep.subr.bf16.mxu0 %v853_v1  ;;  %310 = vmatprep.subr.bf16.mxu1 %v855_v2  ;;  %v859_v5 = vld [vmem:[#allocation3 + $0x24] ss:$16 sps:$4 sm:$0xff]   ;;  %v861_v6 = vld [vmem:[#allocation3 + $0x2c] ss:$16 sps:$4 sm:$0xff]   ;;  %v863_v7 = vld [vmem:[#allocation3 + $0x20] ss:$16 sps:$4 sm:$0xff]  }
  0x29   :  { %270 = vmatpush1.bf16.msra.mxu0 %v857_v3  ;;  %311 = vmatpush1.bf16.msra.mxu1 %v858_v4  ;;  %v864_v8 = vld [vmem:[#allocation3 + $0x28] ss:$16 sps:$4 sm:$0xff]   ;;  %v865_v9 = vld [vmem:[#allocation3 + $0x44] ss:$16 sps:$4 sm:$0xff]   ;;  %v867_v10 = vld [vmem:[#allocation3 + $0x4c] ss:$16 sps:$4 sm:$0xff]   ;;  %v89_v3 = vlaneseq }
  0x2a   :  { %271 = vmatprep.subr.bf16.mxu0 %v859_v5  ;;  %312 = vmatprep.subr.bf16.mxu1 %v861_v6  ;;  %v869_v11 = vld [vmem:[#allocation3 + $0x40] ss:$16 sps:$4 sm:$0xff]   ;;  %v870_v12 = vld [vmem:[#allocation3 + $0x48] ss:$16 sps:$4 sm:$0xff]   ;;  %v871_v13 = vld [vmem:[#allocation3 + $0x64] ss:$16 sps:$4 sm:$0xff]  }
  0x2b   :  { %v873_v14 = vld [vmem:[#allocation3 + $0x6c] ss:$16 sps:$4 sm:$0xff]   ;;  %v875_v15 = vld [vmem:[#allocation3 + $0x60] ss:$16 sps:$4 sm:$0xff]   ;;  %v876_v16 = vld [vmem:[#allocation3 + $0x68] ss:$16 sps:$4 sm:$0xff]  }
  0x2c   :  { %v877_v17 = vld [vmem:[#allocation3 + $0x84] ss:$16 sps:$4 sm:$0xff]   ;;  %v879_v18 = vld [vmem:[#allocation3 + $0x8c] ss:$16 sps:$4 sm:$0xff]   ;;  %v881_v19 = vld [vmem:[#allocation3 + $0x80] ss:$16 sps:$4 sm:$0xff]  }
  0x2d   :  { %272 = vmatpush1.bf16.msra.mxu0 %v863_v7  ;;  %313 = vmatpush1.bf16.msra.mxu1 %v864_v8  ;;  %v882_v20 = vld [vmem:[#allocation3 + $0x88] ss:$16 sps:$4 sm:$0xff]   ;;  %v883_v21 = vld [vmem:[#allocation3 + $0xa4] ss:$16 sps:$4 sm:$0xff]   ;;  %v885_v22 = vld [vmem:[#allocation3 + $0xac] ss:$16 sps:$4 sm:$0xff]  }
  0x2e   :  { %273 = vmatprep.subr.bf16.mxu0 %v865_v9  ;;  %314 = vmatprep.subr.bf16.mxu1 %v867_v10  ;;  %v887_v23 = vld [vmem:[#allocation3 + $0xa0] ss:$16 sps:$4 sm:$0xff]   ;;  %v888_v24 = vld [vmem:[#allocation3 + $0xa8] ss:$16 sps:$4 sm:$0xff]   ;;  %v889_v25 = vld [vmem:[#allocation3 + $0xc4] ss:$16 sps:$4 sm:$0xff]  }
  0x2f   :  { %v891_v26 = vld [vmem:[#allocation3 + $0xcc] ss:$16 sps:$4 sm:$0xff]   ;;  %v893_v27 = vld [vmem:[#allocation3 + $0xc0] ss:$16 sps:$4 sm:$0xff]   ;;  %v894_v28 = vld [vmem:[#allocation3 + $0xc8] ss:$16 sps:$4 sm:$0xff]  }
  0x30   :  { %v895_v29 = vld [vmem:[#allocation3 + $0xe4] ss:$16 sps:$4 sm:$0xff]   ;;  %v897_v30 = vld [vmem:[#allocation3 + $0xec] ss:$16 sps:$4 sm:$0xff]   ;;  %v899_v31 = vld [vmem:[#allocation3 + $0xe0] ss:$16 sps:$4 sm:$0xff]  }
  0x31   :  { %274 = vmatpush1.bf16.msra.mxu0 %v869_v11  ;;  %315 = vmatpush1.bf16.msra.mxu1 %v870_v12  ;;  %v900_v32 = vld [vmem:[#allocation3 + $0xe8] ss:$16 sps:$4 sm:$0xff]   ;;  %v1058_v33 = vld [vmem:[%s1076_s1] sm:$0xf]  ;;  %v909_v43 = vld [vmem:[#allocation5 + $0x50] sm:$0xff]   ;;  %v90_v4 = vshrl.u32 %v89_v3, 7 }
  0x32   :  { %275 = vmatprep.subr.bf16.mxu0 %v871_v13  ;;  %316 = vmatprep.subr.bf16.mxu1 %v873_v14  ;;  %v901_v34 = vld [vmem:[#allocation5 + $0x40] sm:$0xff]   ;;  %v54_v38 = vpack.c.bf16 %v1058_v33, %v1058_v33  ;;  %v906_v40 = vld [vmem:[#allocation5 + $0xc8] sm:$0xff]   ;;  %v910_v44 = vld [vmem:[#allocation5 + $0xd0] sm:$0xff]  }
  0x33   :  { %v902_v35 = vld [vmem:[#allocation5 + $0xc0] sm:$0xff]   ;;  %v907_v41 = vld [vmem:[#allocation5 + $0x8] sm:$0xff]   ;;  %v911_v45 = vld [vmem:[#allocation5 + $0x10] sm:$0xff]   ;;  %v91_v5 = vsub.s32 0, %v90_v4  ;;  %v99_v6 = vsub.s32 2, %v90_v4  ;;  %v95_v8 = vsub.s32 1, %v90_v4 }
  0x34   :  { %v903_v36 = vld [vmem:[#allocation5] sm:$0xff]   ;;  %v908_v42 = vld [vmem:[#allocation5 + $0x88] sm:$0xff]   ;;  %v912_v46 = vld [vmem:[#allocation5 + $0x90] sm:$0xff]   ;;  %v103_v9 = vsub.s32 3, %v90_v4 }
  0x35   :  { %276 = vmatpush1.bf16.msra.mxu0 %v875_v15  ;;  %317 = vmatpush1.bf16.msra.mxu1 %v876_v16  ;;  %v904_v37 = vld [vmem:[#allocation5 + $0x80] sm:$0xff]   ;;  %v913_v47 = vld [vmem:[#allocation5 + $0x58] sm:$0xff]   ;;  %v921_v55 = vld [vmem:[#allocation5 + $0x68] sm:$0xff]  }
  0x36   :  { %277 = vmatprep.subr.bf16.mxu0 %v877_v17  ;;  %318 = vmatprep.subr.bf16.mxu1 %v879_v18  ;;  %v914_v48 = vld [vmem:[#allocation5 + $0xd8] sm:$0xff]   ;;  %v917_v51 = vld [vmem:[#allocation5 + $0x60] sm:$0xff]   ;;  %v922_v56 = vld [vmem:[#allocation5 + $0xe8] sm:$0xff]  }
  0x37   :  { %v915_v49 = vld [vmem:[#allocation5 + $0x18] sm:$0xff]   ;;  %v918_v52 = vld [vmem:[#allocation5 + $0xe0] sm:$0xff]   ;;  %v923_v57 = vld [vmem:[#allocation5 + $0x28] sm:$0xff]  }
  0x38   :  { %v916_v50 = vld [vmem:[#allocation5 + $0x98] sm:$0xff]   ;;  %v919_v53 = vld [vmem:[#allocation5 + $0x20] sm:$0xff]   ;;  %v924_v58 = vld [vmem:[#allocation5 + $0xa8] sm:$0xff]  }
  0x39   :  { %278 = vmatpush1.bf16.msra.mxu0 %v881_v19  ;;  %319 = vmatpush1.bf16.msra.mxu1 %v882_v20  ;;  %v920_v54 = vld [vmem:[#allocation5 + $0xa0] sm:$0xff]   ;;  %v925_v59 = vld [vmem:[#allocation5 + $0x70] sm:$0xff]   ;;  %v929_v63 = vld [vmem:[#allocation5 + $0x78] sm:$0xff]  }
  0x3a   :  { %279 = vmatprep.subr.bf16.mxu0 %v883_v21  ;;  %320 = vmatprep.subr.bf16.mxu1 %v885_v22  ;;  %v926_v60 = vld [vmem:[#allocation5 + $0xf0] sm:$0xff]   ;;  %v930_v0 = vld [vmem:[#allocation5 + $0xf8] sm:$0xff]   ;;  %v87_v7 = vld [vmem:[%s1078_s3] sm:$0xf] }
  0x3b   :  { %v927_v61 = vld [vmem:[#allocation5 + $0x30] sm:$0xff]   ;;  %v931_v1 = vld [vmem:[#allocation5 + $0x38] sm:$0xff]   ;;  %v92_v10 = vrot.slane %v87_v7, %v91_v5  ;;  %v100_v11 = vrot.slane %v87_v7, %v99_v6  ;;  %v96_v12 = vrot.slane %v87_v7, %v95_v8  ;;  %v104_v13 = vrot.slane %v87_v7, %v103_v9 }
  0x3c   :  { %v928_v62 = vld [vmem:[#allocation5 + $0xb0] sm:$0xff]   ;;  %v932_v2 = vld [vmem:[#allocation5 + $0xb8] sm:$0xff]  }
  0x3d   :  { %280 = vmatpush1.bf16.msra.mxu0 %v887_v23  ;;  %321 = vmatpush1.bf16.msra.mxu1 %v888_v24 }
  0x3e   :  { %281 = vmatprep.subr.bf16.mxu0 %v889_v25  ;;  %322 = vmatprep.subr.bf16.mxu1 %v891_v26 }
  0x41   :  { %282 = vmatpush1.bf16.msra.mxu0 %v893_v27  ;;  %323 = vmatpush1.bf16.msra.mxu1 %v894_v28 }
  0x42   :  { %283 = vmatprep.subr.bf16.mxu0 %v895_v29  ;;  %324 = vmatprep.subr.bf16.mxu1 %v897_v30 }
  0x45   :  { %284 = vmatpush1.bf16.msra.mxu0 %v899_v31  ;;  %325 = vmatpush1.bf16.msra.mxu1 %v900_v32 }
  0x46   :  { %802 = vmatprep.subr.bf16.mxu0 %v901_v34  ;;  %824 = vmatprep.subr.bf16.mxu1 %v902_v35 }
  0x48   :  { %302 = vmatmul.mubr.bf16.vlgmr.msra.gmra.mrb[0].mxu0 %v54_v38  ;;  %343 = vmatmul.mubr.bf16.vlgmr.msra.gmra.mrb[0].mxu1 %v54_v38 }
  0x49   :  { %803 = vmatpush3.bf16.msra.mxu0 %v903_v36  ;;  %825 = vmatpush3.bf16.msra.mxu1 %v904_v37 }
  0x4a   :  { %804 = vmatprep.subr.bf16.mxu0 %v905_v39  ;;  %826 = vmatprep.subr.bf16.mxu1 %v906_v40 }
  0x4d   :  { %805 = vmatpush3.bf16.msra.mxu0 %v907_v41  ;;  %827 = vmatpush3.bf16.msra.mxu1 %v908_v42 }
  0x4e   :  { %806 = vmatprep.subr.bf16.mxu0 %v909_v43  ;;  %828 = vmatprep.subr.bf16.mxu1 %v910_v44 }
  0x51   :  { %807 = vmatpush3.bf16.msra.mxu0 %v911_v45  ;;  %829 = vmatpush3.bf16.msra.mxu1 %v912_v46 }
  0x52   :  { %808 = vmatprep.subr.bf16.mxu0 %v913_v47  ;;  %830 = vmatprep.subr.bf16.mxu1 %v914_v48 }
  0x55   :  { %809 = vmatpush3.bf16.msra.mxu0 %v915_v49  ;;  %831 = vmatpush3.bf16.msra.mxu1 %v916_v50 }
  0x56   :  { %810 = vmatprep.subr.bf16.mxu0 %v917_v51  ;;  %832 = vmatprep.subr.bf16.mxu1 %v918_v52 }
  0x59   :  { %811 = vmatpush3.bf16.msra.mxu0 %v919_v53  ;;  %833 = vmatpush3.bf16.msra.mxu1 %v920_v54  ;;  %v769_v53 = vld [vmem:[%s1080_s5] ss:$0 sm:$0xff] }
  0x5a   :  { %812 = vmatprep.subr.bf16.mxu0 %v921_v55  ;;  %834 = vmatprep.subr.bf16.mxu1 %v922_v56 }
  0x5d   :  { %813 = vmatpush3.bf16.msra.mxu0 %v923_v57  ;;  %835 = vmatpush3.bf16.msra.mxu1 %v924_v58 }
  0x5e   :  { %814 = vmatprep.subr.bf16.mxu0 %v925_v59  ;;  %836 = vmatprep.subr.bf16.mxu1 %v926_v60 }
  0x61   :  { %815 = vmatpush3.bf16.msra.mxu0 %v927_v61  ;;  %837 = vmatpush3.bf16.msra.mxu1 %v928_v62 }
  0x62   :  { %816 = vmatprep.subr.bf16.mxu0 %v929_v63  ;;  %838 = vmatprep.subr.bf16.mxu1 %v930_v0  ;;  %v723_v63 = vstv %s1075_s0 }
  0x65   :  { %817 = vmatpush3.bf16.msra.mxu0 %v931_v1  ;;  %839 = vmatpush3.bf16.msra.mxu1 %v932_v2 }
 0x11b   :  { %v303_v14 = vpop.f32.mrb[0].mxu0  ;;  %v344_v15 = vpop.f32.mrb[0].mxu1 }
 0x11c   :  { %v304_v16 = vadd.f32 %v303_v14, %v92_v10  ;;  %v345_v17 = vadd.f32 %v344_v15, %v100_v11  ;;  %v305_v18 = vpop.f32.mrb[1].mxu0  ;;  %v346_v19 = vpop.f32.mrb[1].mxu1 }
 0x11d   :  { %v306_v20 = vadd.f32 %v305_v18, %v96_v12  ;;  %v347_v21 = vadd.f32 %v346_v19, %v104_v13  ;;  %v307_v22 = vpop.f32.mrb[2].mxu0  ;;  %v348_v23 = vpop.f32.mrb[2].mxu1 }
 0x11e   :  { %v355_v24 = vmul.f32 1.442695, %v304_v16  ;;  %v359_v25 = vmul.f32 1.442695, %v345_v17  ;;  %v308_v28 = vpop.f32.mrb[3].mxu0  ;;  %v349_v29 = vpop.f32.mrb[3].mxu1 }
 0x11f   :  { %v357_v26 = vmul.f32 1.442695, %v306_v20  ;;  %v361_v27 = vmul.f32 1.442695, %v347_v21  ;;  %vm351_vm0 = vcmp.gt.f32.partialorder %v304_v16, 0.0  ;;  %vm353_vm1 = vcmp.gt.f32.partialorder %v345_v17, 0.0 }
 0x120   :  { %933 = vpow2.f32 %v355_v24  ;;  %vm352_vm2 = vcmp.gt.f32.partialorder %v306_v20, 0.0  ;;  %vm354_vm3 = vcmp.gt.f32.partialorder %v347_v21, 0.0 }
 0x121   :  { %935 = vpow2.f32 %v359_v25 }
 0x122   :  { %937 = vpow2.f32 %v357_v26 }
 0x123   :  { %939 = vpow2.f32 %v361_v27 }
 0x12a   :  { %v934_v30 = vpop.eup %933 }
 0x12b   :  { %v936_v31 = vpop.eup %935  ;;  %v765_v32 = vadd.f32 -1.0, %v934_v30 }
 0x12c   :  { %v938_v34 = vpop.eup %937  ;;  %v767_v35 = vadd.f32 -1.0, %v936_v31 }
 0x12d   :  { %v940_v36 = vpop.eup %939  ;;  %v367_v37 = vmul.f32 1.6732632, %v765_v32  ;;  %v766_v38 = vadd.f32 -1.0, %v938_v34 }
 0x12e   :  { %v369_v39 = vmul.f32 1.6732632, %v767_v35  ;;  %v768_v40 = vadd.f32 -1.0, %v940_v36 }
 0x12f   :  { %v368_v41 = vmul.f32 1.6732632, %v766_v38  ;;  %v371_v42 = vsel %vm351_vm0, %v304_v16, %v367_v37 }
 0x130   :  { %v370_v43 = vmul.f32 1.6732632, %v768_v40  ;;  %v373_v44 = vsel %vm353_vm1, %v345_v17, %v369_v39  ;;  %v375_v48 = vpack.c.bf16 %v371_v42, %v371_v42 }
 0x131   :  { %v372_v45 = vsel %vm352_vm2, %v306_v20, %v368_v41  ;;  %v377_v50 = vpack.c.bf16 %v373_v44, %v373_v44 }
 0x132   :  { %v376_v46 = vpack.c.bf16 %v372_v45, %v372_v45  ;;  %v374_v47 = vsel %vm354_vm3, %v347_v21, %v370_v43 }
 0x133   :  { %v378_v49 = vpack.c.bf16 %v374_v47, %v374_v47 }
 0x134   :  { %674 = vmatprep.mubr.bf16.mxu0 %v376_v46 }
 0x135   :  { %714 = vmatprep.mubr.bf16.mxu1 %v378_v49  ;;  %675 = vmatmul.mubr.bf16.vlgmr.msra.gmra.mrb[4].mxu0 %v375_v48 }
 0x136   :  { %715 = vmatmul.mubr.bf16.vlgmr.msra.gmra.mrb[4].mxu1 %v377_v50 }
 0x208   :  { %v818_v51 = vpop.f32.mrb[4].mxu0 }
 0x209   :  { %v840_v52 = vpop.f32.mrb[4].mxu1  ;;  %v819_v54 = vpop.f32.mrb[5].mxu0 }
 0x20a   :  { %v820_v55 = vadd.f32 %v819_v54, %v818_v51  ;;  %v841_v56 = vpop.f32.mrb[5].mxu1  ;;  %v821_v57 = vpop.f32.mrb[6].mxu0 }
 0x20b   :  { %v842_v58 = vadd.f32 %v841_v56, %v840_v52  ;;  %v843_v59 = vpop.f32.mrb[6].mxu1  ;;  %v822_v60 = vpop.f32.mrb[7].mxu0 }
 0x20c   :  { %v677_v61 = vadd.f32 %v820_v55, %v769_v53  ;;  %v844_v62 = vpop.f32.mrb[7].mxu1 }
 0x20e   :  { %v717_v0 = vadd.f32 %v842_v58, %v677_v61 }
 0x210   :  { %v724_v1 = vmul.f32 %v723_v63, %v717_v0 }
 0x212   :  { %v725_v2 = vadd.f32 %v724_v1, %v1058_v33 }
 0x214   :  { %726 = vst [vmem:[%s1081_s6] sm:$0xf] %v725_v2 }
 0x215   :  { %731 = vsyncpa [#allocation4], 1 }
 0x216   :  { %732 = vsyncpa [#allocation6], 1 }

</bundles_post_ra>
